<compile_context>
chip_gen: v7x
topology: tpu7x:2x2x1
jax: 0.10.0
libtpu: 0.0.40
codegen_flags: <defaults>
</compile_context>

<pallas_src>
import jax
import jax.numpy as jnp
import numpy as np
from jax.experimental import pallas as pl
from jax.experimental.pallas import tpu as pltpu


def _concat_elu_halves(x):
    """Return (elu(x), elu(-x)) using a single EUP exp: e = exp(-|x|) - 1."""
    e = jnp.exp(-jnp.abs(x)) - 1.0
    return jnp.where(x > 0, x, e), jnp.where(x > 0, e, -x)


def _make_gated_resnet_kernel(C, mxu_dtype, fuse_out, exact_gate):
    """Build the fused kernel for one (C, TS) channels-by-pixels tile."""

    def kernel(x_ref, w1_ref, b1_ref, *rest):
        if fuse_out:
            w2_ref, b2_ref, o_ref = rest
        else:
            w2a_ref, w2b_ref, b2a_ref, b2b_ref, o_ref = rest

        x = x_ref[...].astype(jnp.float32)                       # (C, TS)

        # conv_input(concat_elu(og_x)): single dot, contraction dim K = 2C.
        ep, en = _concat_elu_halves(x)
        h1 = jnp.concatenate([ep, en], axis=0).astype(mxu_dtype)  # (2C, TS)
        y1 = jnp.dot(w1_ref[...], h1,
                     preferred_element_type=jnp.float32) + b1_ref[...]

        # norm_input = identity; skip branch absent (a=None); eval-mode dropout = identity.
        # TODO(synk): training-mode Dropout2d (per-channel Bernoulli mask) and the conv
        # mask argument are not implemented (eval-mode forward only).

        ep2, en2 = _concat_elu_halves(y1)
        h2 = jnp.concatenate([ep2, en2], axis=0).astype(mxu_dtype)  # (2C, TS)

        if fuse_out:
            # One (2C,2C)@(2C,TS) dot; a/b split at the sublane-aligned C boundary.
            ab = jnp.dot(w2_ref[...], h2,
                         preferred_element_type=jnp.float32) + b2_ref[...]
            a, b = ab[:C, :], ab[C:, :]
        else:
            # C not a multiple of 8: keep a/b rows of conv_out pre-split host-side
            # (still K = 2C per dot; no in-kernel slicing across (8,128) tiles).
            a = jnp.dot(w2a_ref[...], h2,
                        preferred_element_type=jnp.float32) + b2a_ref[...]
            b = jnp.dot(w2b_ref[...], h2,
                        preferred_element_type=jnp.float32) + b2b_ref[...]

        if exact_gate:
            gate = jax.nn.sigmoid(b)
        else:
            gate = pl.reciprocal(1.0 + jnp.exp(-b), approx=True)

        # Gated residual in f32; cast only at the store.
        o_ref[...] = (x + a * gate).astype(o_ref.dtype)

    return kernel


def _physical_vmem_bytes():
    """Best-effort physical VMEM query; conservative (v7x-sized) fallback."""
    try:
        info = pltpu.get_tpu_info()
        for attr in ("vmem_capacity_bytes", "vmem_size_bytes", "vmem_bytes"):
            v = getattr(info, attr, None)
            if v:
                return int(v)
    except Exception:
        pass
    return 64 * 1024 * 1024


def gated_resnet_forward(x_nchw, w1, b1, w2, b2, *,
                         stream_dtype=None, mxu_dtype=jnp.bfloat16, ts_cap=1024):
    """Fused gated_resnet forward (eval mode, skip_connection=0, no feature norm).

    x_nchw: (N, C, H, W).
    w1: (C, 2C), b1: (C,)   -- conv_input (2C -> C), PyTorch (out, in) layout.
    w2: (2C, 2C), b2: (2C,) -- conv_out (2C -> 2C).
    stream_dtype: HBM streaming dtype for x / output (bf16 halves streamed bytes on all
      generations incl. v5e; rounds the residual before the add).
    mxu_dtype: dtype of the matmul operands (weights + elu activations). bf16 recovers
      full MXU rate on v5e/v6e/v7x and halves resident weight VMEM; float32 gives a
      bit-faithful path. Elementwise math stays f32 in-kernel regardless.
    """
    N, C, H, W = x_nchw.shape
    HW = H * W
    if stream_dtype is None:
        stream_dtype = x_nchw.dtype
    exact_gate = jnp.dtype(mxu_dtype) == jnp.dtype(jnp.float32)
    fuse_out = (C % 8 == 0)  # a/b split of the fused conv_out stays sublane-aligned

    # NCHW view (N, C, H*W): channels -> sublanes, pixels -> 128-lane axis. Free reshape.
    x_rows = x_nchw.reshape(N, C, HW).astype(stream_dtype)

    # Host-side weight prep (MXU dtype; biases stay f32 for the accumulator add).
    w1m = w1.astype(mxu_dtype)                                  # (C, 2C)
    b1c = b1.reshape(C, 1).astype(jnp.float32)
    if fuse_out:
        w2_args = (w2.astype(mxu_dtype),                        # (2C, 2C)
                   b2.reshape(2 * C, 1).astype(jnp.float32))
    else:
        w2_args = (w2[:C, :].astype(mxu_dtype),                 # (C, 2C) -> a rows
                   w2[C:, :].astype(mxu_dtype),                 # (C, 2C) -> b rows
                   b2[:C].reshape(C, 1).astype(jnp.float32),
                   b2[C:].reshape(C, 1).astype(jnp.float32))

    # --- generation-aware VMEM sizing -------------------------------------------------
    phys_vmem = _physical_vmem_bytes()                          # 64 MiB v7x, 128 MiB v5e/v6e
    vmem_limit = max(32 << 20, min(phys_vmem * 3 // 4, 96 << 20))
    bytes_stream = jnp.dtype(stream_dtype).itemsize
    weight_bytes = 6 * C * C * jnp.dtype(mxu_dtype).itemsize + 3 * C * 4
    tile_budget = max(4 << 20, vmem_limit - weight_bytes - (4 << 20))
    # ~16 f32 (C, ts)-equivalent compiler-materialized slabs (x_f32, stacked elu halves,
    # y1, a/b, bf16 casts, gate temps) + double-buffered streaming in/out tiles.
    per_lane_col = (16 * 4 + 4 * bytes_stream) * C
    max_ts = max(128, (tile_budget // per_lane_col) // 128 * 128)

    # Spatial (lane) tile: multiple of 128, prefer an exact divisor of HW (unmasked
    # lane-dense stores), then shrink until both v7x TensorCores have work.
    if HW <= 128:
        ts = HW
    else:
        cap = max(128, min(ts_cap, max_ts, (HW // 128) * 128))
        ts = next((c for c in range(cap, 127, -128) if HW % c == 0), cap)
        while N * pl.cdiv(HW, ts) < 4 and ts > 128:
            ts = max(128, ((ts // 2) // 128) * 128)
    grid = (N, pl.cdiv(HW, ts))  # ragged last tile (if any) is masked by Pallas

    def x_map(n, s):
        return (n, 0, s)

    def const_map(n, s):
        return (0, 0)

    resident = dict(pipeline_mode=pl.Buffered(1))  # grid-invariant: single-buffer

    in_specs = [
        pl.BlockSpec((None, C, ts), x_map),
        pl.BlockSpec((C, 2 * C), const_map, **resident),
        pl.BlockSpec((C, 1), const_map, **resident),
    ]
    if fuse_out:
        in_specs += [
            pl.BlockSpec((2 * C, 2 * C), const_map, **resident),
            pl.BlockSpec((2 * C, 1), const_map, **resident),
        ]
    else:
        in_specs += [
            pl.BlockSpec((C, 2 * C), const_map, **resident),
            pl.BlockSpec((C, 2 * C), const_map, **resident),
            pl.BlockSpec((C, 1), const_map, **resident),
            pl.BlockSpec((C, 1), const_map, **resident),
        ]

    kernel = _make_gated_resnet_kernel(C, mxu_dtype, fuse_out, exact_gate)

    out_rows = pl.pallas_call(
        kernel,
        out_shape=jax.ShapeDtypeStruct((N, C, HW), stream_dtype),
        grid=grid,
        in_specs=in_specs,
        out_specs=pl.BlockSpec((None, C, ts), x_map),
        compiler_params=pltpu.CompilerParams(
            dimension_semantics=("parallel", "parallel"),
            vmem_limit_bytes=int(vmem_limit),
        ),
    )(x_rows, w1m, b1c, *w2_args)

    return out_rows.reshape(N, C, H, W)


def _make_wn_linear_weight(key, dim_in, dim_out):
    """Weight-normed Linear params in PyTorch (dim_out, dim_in) orientation."""
    kv, kb = jax.random.split(key)
    bound = 1.0 / np.sqrt(dim_in)
    v = jax.random.uniform(kv, (dim_out, dim_in), jnp.float32, -bound, bound)
    g = jnp.sqrt(jnp.sum(v * v, axis=1, keepdims=True))          # wn init: g = ||v||
    w = g * v / jnp.sqrt(jnp.sum(v * v, axis=1, keepdims=True))  # effective weight (= v at init)
    b = jax.random.uniform(kb, (dim_out,), jnp.float32, -bound, bound)
    return w, b


def _reference_forward(x, w1, b1, w2, b2):
    """Plain-JAX NCHW reference mirroring the PyTorch forward."""
    C = x.shape[1]

    def concat_elu(t):
        h = jnp.concatenate([t, -t], axis=1)
        return jnp.where(h > 0, h, jnp.exp(jnp.minimum(h, 0.0)) - 1.0)

    y1 = jnp.einsum('oc,nchw->nohw', w1, concat_elu(x)) + b1[None, :, None, None]
    y2 = jnp.einsum('oc,nchw->nohw', w2, concat_elu(y1)) + b2[None, :, None, None]
    a, b = y2[:, :C], y2[:, C:]
    return x + a * jax.nn.sigmoid(b)


if __name__ == "__main__":
    key = jax.random.PRNGKey(0)
    k_x, k_w1, k_w2 = jax.random.split(key, 3)

    N, C, H, W = 2, 4, 16, 16          # num_filters = 4
    x = jax.random.normal(k_x, (N, C, H, W), jnp.float32)

    w1, b1 = _make_wn_linear_weight(k_w1, 2 * C, C)       # conv_input: 2C -> C
    w2, b2 = _make_wn_linear_weight(k_w2, 2 * C, 2 * C)   # conv_out:   2C -> 2C

    ref = _reference_forward(x, w1, b1, w2, b2)

    # Bit-faithful path (f32 streaming + f32 MXU operands + exact sigmoid): tight tolerance.
    out_exact = gated_resnet_forward(x, w1, b1, w2, b2, mxu_dtype=jnp.float32)
    out_exact = jax.block_until_ready(out_exact)
    assert out_exact.shape == (N, C, H, W)
    np.testing.assert_allclose(np.asarray(out_exact), np.asarray(ref), rtol=1e-5, atol=1e-5)

    # Default fast path: f32 streaming, bf16 MXU operands, approx-reciprocal gate.
    out_fast = gated_resnet_forward(x, w1, b1, w2, b2)
    out_fast = jax.block_until_ready(out_fast)
    np.testing.assert_allclose(np.asarray(out_fast), np.asarray(ref), rtol=5e-2, atol=5e-2)

    # bf16 streaming path (HBM-bandwidth optimization on all gens incl. v5e).
    out_bf16 = gated_resnet_forward(x, w1, b1, w2, b2, stream_dtype=jnp.bfloat16)
    out_bf16 = jax.block_until_ready(out_bf16)
    np.testing.assert_allclose(np.asarray(out_bf16.astype(jnp.float32)), np.asarray(ref),
                               rtol=5e-2, atol=5e-2)

    print("KERNEL_OK")
</pallas_src>

<mosaic_0001>
module attributes {stable_mosaic.version = 11 : i64} {
  func.func @kernel(%arg0: i32, %arg1: i32, %arg2: memref<1x4x128xf32, #tpu.memory_space<vmem>>, %arg3: memref<4x8xf32, #tpu.memory_space<vmem>>, %arg4: memref<4x1xf32, #tpu.memory_space<vmem>>, %arg5: memref<4x8xf32, #tpu.memory_space<vmem>>, %arg6: memref<4x8xf32, #tpu.memory_space<vmem>>, %arg7: memref<4x1xf32, #tpu.memory_space<vmem>>, %arg8: memref<4x1xf32, #tpu.memory_space<vmem>>, %arg9: memref<1x4x128xf32, #tpu.memory_space<vmem>>) attributes {dimension_semantics = [#tpu.dimension_semantics<parallel>, #tpu.dimension_semantics<parallel>], iteration_bounds = array<i64: 2, 2>, scalar_prefetch = 0 : i64, scratch_operands = 0 : i64, tpu.core_type = #tpu.core_type<tc>, window_params = [{transform_indices = @transform_0, window_bounds = array<i64: 1, 4, 128>}, {pipeline_mode = #tpu.pipeline_mode<synchronous>, transform_indices = @transform_1, window_bounds = array<i64: 4, 8>}, {pipeline_mode = #tpu.pipeline_mode<synchronous>, transform_indices = @transform_2, window_bounds = array<i64: 4, 1>}, {pipeline_mode = #tpu.pipeline_mode<synchronous>, transform_indices = @transform_3, window_bounds = array<i64: 4, 8>}, {pipeline_mode = #tpu.pipeline_mode<synchronous>, transform_indices = @transform_4, window_bounds = array<i64: 4, 8>}, {pipeline_mode = #tpu.pipeline_mode<synchronous>, transform_indices = @transform_5, window_bounds = array<i64: 4, 1>}, {pipeline_mode = #tpu.pipeline_mode<synchronous>, transform_indices = @transform_6, window_bounds = array<i64: 4, 1>}, {transform_indices = @transform_7, window_bounds = array<i64: 1, 4, 128>}]} {
    %c0 = arith.constant 0 : index
    %c0_0 = arith.constant 0 : index
    %c0_1 = arith.constant 0 : index
    %0 = vector.load %arg2[%c0, %c0_0, %c0_1] : memref<1x4x128xf32, #tpu.memory_space<vmem>>, vector<1x4x128xf32>
    %1 = vector.shape_cast %0 : vector<1x4x128xf32> to vector<4x128xf32>
    %2 = math.absf %1 : vector<4x128xf32>
    %cst = arith.constant 0.000000e+00 : f32
    %3 = vector.broadcast %cst : f32 to vector<4x128xf32>
    %4 = arith.subf %3, %2 : vector<4x128xf32>
    %5 = math.exp %4 : vector<4x128xf32>
    %cst_2 = arith.constant 1.000000e+00 : f32
    %6 = vector.broadcast %cst_2 : f32 to vector<4x128xf32>
    %7 = arith.subf %5, %6 : vector<4x128xf32>
    %cst_3 = arith.constant 0.000000e+00 : f32
    %8 = vector.broadcast %cst_3 : f32 to vector<4x128xf32>
    %9 = arith.cmpf ogt, %1, %8 : vector<4x128xf32>
    %10 = arith.select %9, %1, %7 : vector<4x128xi1>, vector<4x128xf32>
    %cst_4 = arith.constant 0.000000e+00 : f32
    %11 = vector.broadcast %cst_4 : f32 to vector<4x128xf32>
    %12 = arith.cmpf ogt, %1, %11 : vector<4x128xf32>
    %cst_5 = arith.constant 0.000000e+00 : f32
    %13 = vector.broadcast %cst_5 : f32 to vector<4x128xf32>
    %14 = arith.subf %13, %1 : vector<4x128xf32>
    %15 = arith.select %12, %7, %14 : vector<4x128xi1>, vector<4x128xf32>
    %16 = tpu.concatenate %10, %15 in 0 : vector<4x128xf32>, vector<4x128xf32> -> vector<8x128xf32>
    %c0_6 = arith.constant 0 : index
    %c0_7 = arith.constant 0 : index
    %17 = vector.load %arg3[%c0_6, %c0_7] : memref<4x8xf32, #tpu.memory_space<vmem>>, vector<4x8xf32>
    %cst_8 = arith.constant dense<0.000000e+00> : vector<4x128xf32>
    %18 = tpu.matmul %17, %16, %cst_8 {dimension_numbers = #tpu.dot_dimension_numbers<[1], [0], [0], [1], [0, 0, 1, 1], [], []>} : vector<4x8xf32>, vector<8x128xf32>, vector<4x128xf32> -> vector<4x128xf32>
    %c0_9 = arith.constant 0 : index
    %c0_10 = arith.constant 0 : index
    %19 = vector.load %arg4[%c0_9, %c0_10] : memref<4x1xf32, #tpu.memory_space<vmem>>, vector<4x1xf32>
    %20 = vector.broadcast %19 : vector<4x1xf32> to vector<4x128xf32>
    %21 = arith.addf %18, %20 : vector<4x128xf32>
    %22 = math.absf %21 : vector<4x128xf32>
    %cst_11 = arith.constant 0.000000e+00 : f32
    %23 = vector.broadcast %cst_11 : f32 to vector<4x128xf32>
    %24 = arith.subf %23, %22 : vector<4x128xf32>
    %25 = math.exp %24 : vector<4x128xf32>
    %cst_12 = arith.constant 1.000000e+00 : f32
    %26 = vector.broadcast %cst_12 : f32 to vector<4x128xf32>
    %27 = arith.subf %25, %26 : vector<4x128xf32>
    %cst_13 = arith.constant 0.000000e+00 : f32
    %28 = vector.broadcast %cst_13 : f32 to vector<4x128xf32>
    %29 = arith.cmpf ogt, %21, %28 : vector<4x128xf32>
    %30 = arith.select %29, %21, %27 : vector<4x128xi1>, vector<4x128xf32>
    %cst_14 = arith.constant 0.000000e+00 : f32
    %31 = vector.broadcast %cst_14 : f32 to vector<4x128xf32>
    %32 = arith.cmpf ogt, %21, %31 : vector<4x128xf32>
    %cst_15 = arith.constant 0.000000e+00 : f32
    %33 = vector.broadcast %cst_15 : f32 to vector<4x128xf32>
    %34 = arith.subf %33, %21 : vector<4x128xf32>
    %35 = arith.select %32, %27, %34 : vector<4x128xi1>, vector<4x128xf32>
    %36 = tpu.concatenate %30, %35 in 0 : vector<4x128xf32>, vector<4x128xf32> -> vector<8x128xf32>
    %c0_16 = arith.constant 0 : index
    %c0_17 = arith.constant 0 : index
    %37 = vector.load %arg5[%c0_16, %c0_17] : memref<4x8xf32, #tpu.memory_space<vmem>>, vector<4x8xf32>
    %cst_18 = arith.constant dense<0.000000e+00> : vector<4x128xf32>
    %38 = tpu.matmul %37, %36, %cst_18 {dimension_numbers = #tpu.dot_dimension_numbers<[1], [0], [0], [1], [0, 0, 1, 1], [], []>} : vector<4x8xf32>, vector<8x128xf32>, vector<4x128xf32> -> vector<4x128xf32>
    %c0_19 = arith.constant 0 : index
    %c0_20 = arith.constant 0 : index
    %39 = vector.load %arg7[%c0_19, %c0_20] : memref<4x1xf32, #tpu.memory_space<vmem>>, vector<4x1xf32>
    %40 = vector.broadcast %39 : vector<4x1xf32> to vector<4x128xf32>
    %41 = arith.addf %38, %40 : vector<4x128xf32>
    %c0_21 = arith.constant 0 : index
    %c0_22 = arith.constant 0 : index
    %42 = vector.load %arg6[%c0_21, %c0_22] : memref<4x8xf32, #tpu.memory_space<vmem>>, vector<4x8xf32>
    %cst_23 = arith.constant dense<0.000000e+00> : vector<4x128xf32>
    %43 = tpu.matmul %42, %36, %cst_23 {dimension_numbers = #tpu.dot_dimension_numbers<[1], [0], [0], [1], [0, 0, 1, 1], [], []>} : vector<4x8xf32>, vector<8x128xf32>, vector<4x128xf32> -> vector<4x128xf32>
    %c0_24 = arith.constant 0 : index
    %c0_25 = arith.constant 0 : index
    %44 = vector.load %arg8[%c0_24, %c0_25] : memref<4x1xf32, #tpu.memory_space<vmem>>, vector<4x1xf32>
    %45 = vector.broadcast %44 : vector<4x1xf32> to vector<4x128xf32>
    %46 = arith.addf %43, %45 : vector<4x128xf32>
    %47 = arith.negf %46 : vector<4x128xf32>
    %48 = math.exp %47 : vector<4x128xf32>
    %cst_26 = arith.constant 1.000000e+00 : f32
    %49 = vector.broadcast %cst_26 : f32 to vector<4x128xf32>
    %50 = arith.addf %49, %48 : vector<4x128xf32>
    %51 = arith.divf %49, %50 : vector<4x128xf32>
    %52 = arith.mulf %41, %51 : vector<4x128xf32>
    %53 = arith.addf %1, %52 : vector<4x128xf32>
    %c0_27 = arith.constant 0 : index
    %c0_28 = arith.constant 0 : index
    %c0_29 = arith.constant 0 : index
    %54 = vector.load %arg9[%c0_27, %c0_28, %c0_29] : memref<1x4x128xf32, #tpu.memory_space<vmem>>, vector<1x4x128xf32>
    %55 = vector.shape_cast %54 : vector<1x4x128xf32> to vector<4x128xf32>
    %56 = vector.shape_cast %53 : vector<4x128xf32> to vector<1x4x128xf32>
    tpu.vector_store %arg9[%c0_27, %c0_28, %c0_29], %56 {strides = array<i32>} : memref<1x4x128xf32, #tpu.memory_space<vmem>>, vector<1x4x128xf32>,
    return
  }
  func.func @transform_0(%arg0: i32, %arg1: i32) -> (i32, i32, i32) {
    %c0_i32 = arith.constant 0 : i32
    %c0_i32_0 = arith.constant 0 : i32
    return %arg0, %c0_i32, %arg1 : i32, i32, i32
  }
  func.func @transform_1(%arg0: i32, %arg1: i32) -> (i32, i32) {
    %c0_i32 = arith.constant 0 : i32
    %c0_i32_0 = arith.constant 0 : i32
    %c0_i32_1 = arith.constant 0 : i32
    return %c0_i32, %c0_i32_0 : i32, i32
  }
  func.func @transform_2(%arg0: i32, %arg1: i32) -> (i32, i32) {
    %c0_i32 = arith.constant 0 : i32
    %c0_i32_0 = arith.constant 0 : i32
    %c0_i32_1 = arith.constant 0 : i32
    return %c0_i32, %c0_i32_0 : i32, i32
  }
  func.func @transform_3(%arg0: i32, %arg1: i32) -> (i32, i32) {
    %c0_i32 = arith.constant 0 : i32
    %c0_i32_0 = arith.constant 0 : i32
    %c0_i32_1 = arith.constant 0 : i32
    return %c0_i32, %c0_i32_0 : i32, i32
  }
  func.func @transform_4(%arg0: i32, %arg1: i32) -> (i32, i32) {
    %c0_i32 = arith.constant 0 : i32
    %c0_i32_0 = arith.constant 0 : i32
    %c0_i32_1 = arith.constant 0 : i32
    return %c0_i32, %c0_i32_0 : i32, i32
  }
  func.func @transform_5(%arg0: i32, %arg1: i32) -> (i32, i32) {
    %c0_i32 = arith.constant 0 : i32
    %c0_i32_0 = arith.constant 0 : i32
    %c0_i32_1 = arith.constant 0 : i32
    return %c0_i32, %c0_i32_0 : i32, i32
  }
  func.func @transform_6(%arg0: i32, %arg1: i32) -> (i32, i32) {
    %c0_i32 = arith.constant 0 : i32
    %c0_i32_0 = arith.constant 0 : i32
    %c0_i32_1 = arith.constant 0 : i32
    return %c0_i32, %c0_i32_0 : i32, i32
  }
  func.func @transform_7(%arg0: i32, %arg1: i32) -> (i32, i32, i32) {
    %c0_i32 = arith.constant 0 : i32
    %c0_i32_0 = arith.constant 0 : i32
    return %arg0, %c0_i32, %arg1 : i32, i32, i32
  }
}

</mosaic_0001>

<bundles_post_ra>
// kernel: tpu_custom_call.1
= control target key start
LH: loop header
LB: loop body
LE: loop exit
PB: predicated region body
PF: predicated region fallthrough
CT: control target
= control target key end

     0   :  { %s1230_s0 = inlined_call_operand.hbm [shape: f32[2,4,256], index: 0, kind: input, shape index: {}]   ;;  %s1231_s1 = inlined_call_operand.vmem [shape: f32[4,8], index: 1, kind: input, shape index: {}]   ;;  %s1232_s2 = inlined_call_operand.vmem [shape: f32[4,1], index: 2, kind: input, shape index: {}]   ;;  %s1233_s3 = inlined_call_operand.vmem [shape: f32[4,8], index: 3, kind: input, shape index: {}]   ;;  %s1234_s4 = inlined_call_operand.vmem [shape: f32[4,8], index: 4, kind: input, shape index: {}]   ;;  %s1235_s5 = inlined_call_operand.vmem [shape: f32[4,1], index: 5, kind: input, shape index: {}]   ;;  %s1236_s6 = inlined_call_operand.vmem [shape: f32[4,1], index: 6, kind: input, shape index: {}]   ;;  %s1237_s7 = inlined_call_operand.hbm [shape: f32[2,4,256], index: 7, kind: output, shape index: {}]  }
   0x1   :  { %1243 = sst [smem:[#allocation11_spill]] %s1237_s7 }
   0x2   :  { %12 = vsyncpa [#allocation3], 0 }
   0x3   :  { %14 = vsyncpa [#allocation3 + $0x1], 0 }
   0x4   :  { %15 = vsyncpa [#allocation4], 0 }
   0x5   :  { %17 = vsyncpa [#allocation4 + $0x1], 0  ;;  %s999_s24 = smov 0   ;;  %s1001_s25 = smov 0  }
   0x6   :  { %s1003_s26 = smov 0   ;;  %s1005_s27 = smov 0  }
   0x7   :  { %s1007_s28 = smov 0   ;;  %s1009_s29 = smov 0  }
   0x8   :  { %s1011_s30 = smov 0   ;;  %s1013_s8 = smov 0  }
   0x9 LB: > { %1244 = sst [smem:[#allocation8_spill]] %s924_s24  ;;  %s691_s9 = sadd.s32 4294967295, %s952_s8   ;;  %s952_s8 = sphi %s1013_s8, %s23_s8   ;;  %s948_s30 = sphi %s1011_s30, %s1266_s30   ;;  %s944_s29 = sphi %s1009_s29, %s1265_s29   ;;  %s940_s28 = sphi %s1007_s28, %s1264_s28   ;;  %s936_s27 = sphi %s1005_s27, %s1263_s27   ;;  %s932_s26 = sphi %s1003_s26, %s1262_s26   ;;  %s928_s25 = sphi %s1001_s25, %s1261_s25   ;;  %s924_s24 = sphi %s999_s24, %s1260_s24  }
   0xa   : > { %s692_s10 = sadd.s32 4294967294, %s952_s8   ;;  %s32_s11 = sadd.s32 1, %s944_s29 }
   0xb   : > { %s35_s12 = sadd.s32 1, %s948_s30  ;;  %p33_p0 = scmp.ge.s32.totalorder %s32_s11, 2 }
   0xc   : > { %s44_s13 = sadd.s32 1, %s932_s26  ;;  %p51_p1 = scmp.ne.s32.totalorder %s932_s26, %s928_s25 }
   0xd   : > { %p52_p2 = scmp.eq.s32.totalorder %s952_s8, 0  ;;  %s1268_s11 = smov (%p33_p0, %s32_s11), 0 }
   0xe   : > { %1245 = sst [smem:[#allocation9_spill]] %s1268_s11  ;;  %s1270_s12 = smov (!%p33_p0, %s35_s12), %s948_s30 }
   0xf   : > { %s40_s14 = ssub.s32 %s944_s29, %s1268_s11  ;;  %p1052_p3 = por %p52_p2, %p51_p1 }
  0x10   : > { %p37_p4 = scmp.ge.s32.totalorder %s1270_s12, 2  ;;  %p57_p5 = scmp.ne.s32.totalorder %s928_s25, %s924_s24 }
  0x11   : > { %p58_p6 = scmp.eq.s32.totalorder %s691_s9, 0  ;;  %p209_p7 = scmp.eq.s32.totalorder %s691_s9, 3 }
  0x12   : > { %s1272_s12 = smov (%p37_p4, %s1270_s12), 0  ;;  %p215_p10 = scmp.eq.s32.totalorder %s692_s10, 3 }
  0x13   : > { %1247 = sst [smem:[#allocation10_spill]] %s1272_s12  ;;  %p1060_p8 = por %p58_p6, %p57_p5 }
  0x14   : > { %p1064_p9 = por %p209_p7, %p51_p1  ;;  %s39_s18 = ssub.s32 %s948_s30, %s1272_s12 }
  0x15   : > { %s41_s19 = sor.u32 %s40_s14, %s39_s18  ;;  %p1070_p12 = por %p215_p10, %p57_p5 }
  0x16   : > { %s1249_s17 = scalar_select %p1064_p9, 1, 0 }
  0x17   : > { %p42_p11 = scmp.eq.s32.totalorder %s41_s19, 0  ;;  %p745_p13 = scmp.lt.s32.totalorder %s952_s8, 4 }
  0x18   : > { %s1250_s20 = scalar_select %p1070_p12, 1, 0 }
  0x19   : > { %s253_s21 = sand.u32 1, %s932_s26   ;;  %s696_s9 = sshll.u32 %s948_s30, 1 }
  0x1a   : > { %s1077_s22 = scalar_select %p42_p11, %s932_s26, %s44_s13  }
  0x1b   : > { %s695_s23 = sshll.u32 %s253_s21, 2  ;;  %s262_s11 = sadd.s32 %s944_s29, %s696_s9 }
  0x1c   : > { %s257_s24 = scalar_lea.vmem [#allocation2], %s695_s23  ;;  %s697_s12 = sshll.u32 %s262_s11, 6 }
  0x1d   : > { %s266_s7 = sshll.u32 %s257_s24, 4  ;;  %s1086_s18 = scalar_lea.hbm %s1230_s0, %s697_s12  ;;  %s1081_s7 = int_to_ptr.vmem [resolvable:$true] %s266_s7 }
  0x1e   : > { %p1090_p0 = pnand %p745_p13, %p1052_p3  ;;  %s254_s24 = scalar_lea.sflag [#allocation3], %s253_s21 }
  0x1f   : > { %s824_s11 = scalar_lea.hbm %s1086_s18, 64  ;;  %s829_s19 = scalar_lea.hbm %s1230_s0, 256 }
  0x20   : > { %p825_p4 = scmp.ne.s32.totalorder %s1086_s18, %s824_s11  ;;  %p826_p5 = pneg %p1090_p0 }
  0x21   : > { %p830_p3 = scmp.lt.u32.totalorder %s1086_s18, %s1230_s0  ;;  %p831_p10 = scmp.lt.u32.totalorder %s829_s19, %s824_s11 }
  0x22   : > { %p827_p6 = pnand %p826_p5, %p825_p4  ;;  %p833_p13 = scmp.lt.u32.totalorder %s824_s11, %s1086_s18 }
  0x23   : > { %p832_p11 = por %p831_p10, %p830_p3 }
  0x24   : > { %p828_p7 = pneg %p827_p6 }
  0x25   : > { %p834_p1 = por %p833_p13, %p832_p11 }
  0x27   : > { %p835_p2 = pnand %p834_p1, %p828_p7 }
  0x29   : > { %838 = shalt.err (!%p835_p2)
}
  0x2a   : > { %s839_s21 = scalar_lea.vmem %s1081_s7, 64  ;;  %s954_s10 = smov [#allocation2]  }
  0x2b   : > { %p840_p4 = scmp.ne.s32.totalorder %s1081_s7, %s839_s21  ;;  %s844_s14 = sshll.u32 %s954_s10, 4  ;;  %s845_s14 = int_to_ptr.vmem [resolvable:$false] %s844_s14 }
  0x2c   : > { %s846_s12 = scalar_lea.vmem %s845_s14, 128  ;;  %p847_p9 = scmp.lt.s32.totalorder %s1081_s7, %s845_s14 }
  0x2d   : > { %p842_p6 = pnand %p840_p4, %p826_p5  ;;  %p848_p3 = scmp.lt.s32.totalorder %s846_s12, %s839_s21 }
  0x2f   : > { %p843_p12 = pneg %p842_p6  ;;  %p849_p10 = por %p848_p3, %p847_p9 }
  0x31   : > { %p850_p11 = pnand %p849_p10, %p843_p12 }
  0x33   : > { %853 = shalt.err (!%p850_p11)
}
  0x34   : > { %740 = dma.hbm_to_vmem [thread:$0]  (!%p1090_p0), %s1086_s18, 64, %s1081_s7, %s254_s24  }
  0x35   : > { %p1252_p1 = scmp.lt.s32.totalorder %s952_s8, 5  ;;  %p1253_p2 = scmp.ge.s32.totalorder %s952_s8, 1 }
  0x37   : > { %p272_p5 = pnand %p1253_p2, %p1252_p1 }
  0x38   : > { %s1126_s11 = sand.u32 (!%p272_p5), 1, %s928_s25  }
  0x39   : > { %275 = sbr.rel (%p272_p5) target bundleno = 586 (0x24a), region = 48  ;;  %s699_s15 = sshll.u32 (!%p272_p5), %s1126_s11, 2 }
  0x3a   : > { %s278_s19 = scalar_lea.sflag (!%p272_p5), [#allocation3], %s1126_s11  ;;  %s281_s13 = scalar_lea.vmem (!%p272_p5), [#allocation2], %s699_s15 }
  0x40   : > { %915 = dma.done.wait (%p1060_p8), %s278_s19, 64  }
  0x41   : > { %917 = vsyncadd (%p1060_p8), %s278_s19, 4294967232  ;;  %v955_v0 = vmov 0.0   ;;  %vm956_vm0 = vmmov 0   ;;  %v957_v1 = vmov 0   ;;  %v1138_v2 = vld [vmem:[%s281_s13] sm:$0xf] }
  0x42   : > { %718 = vmatprep.subr.mxu0 %v955_v0  ;;  %720 = vmatprep.mubr.msk.f32.mxu0 %vm956_vm0, %v955_v0  ;;  %v328_v3 = vld [vmem:[%s1232_s2] sm:$0xf]  ;;  %v313_v4 = vand.u32 2147483647, %v1138_v2  ;;  %v320_v8 = vsub.f32 0.0, %v1138_v2  ;;  %vm318_vm1 = vcmp.gt.f32.partialorder %v1138_v2, 0.0 }
  0x43   : > { %814 = vset.pattern.permute.xlu0 %v957_v1  ;;  %723 = vmatprep.subr.mxu1 %v955_v0  ;;  %v502_v5 = vld [vmem:[%s1236_s6] sm:$0xf]  ;;  %vm325_vm2 = vcmask 1043456   ;;  %vm334_vm3 = vcmask 64512   ;;  %s708_s7 = sshll.u32 %s940_s28, 1  ;;  %s311_s24 = scalar_lea.vmem [#allocation5], %s699_s15 }
  0x44   : > { %725 = vmatprep.mubr.msk.f32.mxu1 %vm956_vm0, %v955_v0  ;;  %815 = vset.pattern.permute.xlu1 %v957_v1  ;;  %v314_v6 = vsub.f32 0.0, %v313_v4  ;;  %v327_v14 = vld [vmem:[%s1231_s1] sm:$0xf]  ;;  %s602_s18 = sadd.s32 %s936_s27, %s708_s7  ;;  %s606_s23 = sshll.u32 %s311_s24, 4  ;;  %s1178_s23 = int_to_ptr.vmem [resolvable:$true] %s606_s23 }
  0x45   : > { %331 = vperm.xlu0 %814, %v328_v3   ;;  %v422_v16 = vld [vmem:[%s1235_s5] sm:$0xf]  ;;  %s709_s16 = sshll.u32 %s602_s18, 6  ;;  %s1254_s10 = sld [smem:[#allocation11_spill]] }
  0x46   : > { %v315_v7 = vmul.f32 1.442695, %v314_v6  ;;  %425 = vperm.xlu1 %815, %v422_v16   ;;  %v501_v30 = vld [vmem:[%s1234_s4] sm:$0xf]  ;;  %s591_s27 = scalar_lea.sflag [#allocation4], %s1126_s11  ;;  %s854_s28 = scalar_lea.vmem %s1178_s23, 64 }
  0x47   : > { %v421_v31 = vld [vmem:[%s1233_s3] sm:$0xf]  ;;  %p855_p8 = scmp.ne.s32.totalorder %s1178_s23, %s854_s28  ;;  %p1255_p9 = scmp.ne.s32.totalorder %s1249_s17, 0 }
  0x48   : > { %816 = vpow2.f32 %v315_v7  ;;  %s958_s15 = smov [#allocation5]  }
  0x49   : > { %505 = vperm.xlu0 %814, %v502_v5   ;;  %p856_p12 = pnand %p855_p8, %p1255_p9  ;;  %s858_s12 = sshll.u32 %s958_s15, 4  ;;  %s859_s12 = int_to_ptr.vmem [resolvable:$false] %s858_s12 }
  0x4a   : > { %s860_s19 = scalar_lea.vmem %s859_s12, 128  ;;  %p861_p7 = scmp.lt.s32.totalorder %s1178_s23, %s859_s12 }
  0x4b   : > { %s1176_s14 = scalar_lea.hbm %s1254_s10, %s709_s16  ;;  %p857_p0 = pneg %p856_p12 }
  0x4c   : > { %p862_p13 = scmp.lt.s32.totalorder %s860_s19, %s854_s28 }
  0x4e   : > { %p863_p4 = por %p862_p13, %p861_p7 }
  0x50   : > { %p864_p6 = pnand %p863_p4, %p857_p0 }
  0x52   : > { %v817_v9 = vpop.eup %816 }
  0x53   : > { %v701_v10 = vadd.f32 -1.0, %v817_v9 }
  0x55   : > { %v319_v11 = vsel %vm318_vm1, %v1138_v2, %v701_v10  ;;  %v321_v12 = vsel %vm318_vm1, %v701_v10, %v320_v8 }
  0x56   : > { %v323_v13 = vrot.slane %v321_v12, 4 }
  0x58   : > { %v326_v15 = vsel %vm325_vm2, %v319_v11, %v323_v13 }
  0x59   : > { %719 = vmatpush3.msra.mxu0 %v326_v15 }
  0x5a   : > { %721 = vmatmul.mubr.msk.f32.vlgmr.msra.gmra.mrb[0].mxu0 %vm334_vm3, %v327_v14  ;;  %728 = vmatprep.subr.mxu0 %v955_v0 }
  0x5b   : > { %730 = vmatprep.mubr.msk.f32.mxu0 %vm956_vm0, %v955_v0 }
  0xc4   : > { %v332_v17 = vpop.permute.xlu0 %331 }
  0xc5   : > { %v426_v42 = vpop.permute.xlu1 %425 }
  0xc8   : > { %v506_v33 = vpop.permute.xlu0 %505 }
 0x12d   : > { %v404_v18 = vpop.f32.mrb[0].mxu0 }
 0x12e   : > { %v405_v19 = vadd.f32 %v404_v18, %v332_v17  ;;  %v722_v20 = vpop.f32.mrb[1].mxu0 }
 0x130   : > { %v408_v21 = vand.u32 2147483647, %v405_v19  ;;  %v415_v25 = vsub.f32 0.0, %v405_v19  ;;  %vm413_vm4 = vcmp.gt.f32.partialorder %v405_v19, 0.0 }
 0x132   : > { %v409_v22 = vsub.f32 0.0, %v408_v21 }
 0x134   : > { %v410_v23 = vmul.f32 1.442695, %v409_v22 }
 0x136   : > { %818 = vpow2.f32 %v410_v23 }
 0x140   : > { %v819_v24 = vpop.eup %818 }
 0x141   : > { %v703_v26 = vadd.f32 -1.0, %v819_v24 }
 0x143   : > { %v416_v27 = vsel %vm413_vm4, %v703_v26, %v415_v25  ;;  %v414_v29 = vsel %vm413_vm4, %v405_v19, %v703_v26 }
 0x144   : > { %v418_v28 = vrot.slane %v416_v27, 4 }
 0x146   : > { %v420_v32 = vsel %vm325_vm2, %v414_v29, %v418_v28 }
 0x147   : > { %724 = vmatpush3.msra.mxu1 %v420_v32  ;;  %729 = vmatpush3.msra.mxu0 %v420_v32 }
 0x148   : > { %731 = vmatmul.mubr.msk.f32.vlgmr.msra.gmra.mrb[2].mxu0 %vm334_vm3, %v501_v30  ;;  %726 = vmatmul.mubr.msk.f32.vlgmr.msra.gmra.mrb[0].mxu1 %vm334_vm3, %v421_v31 }
 0x21b   : > { %v577_v34 = vpop.f32.mrb[2].mxu0  ;;  %v497_v35 = vpop.f32.mrb[0].mxu1 }
 0x21c   : > { %v578_v36 = vadd.f32 %v577_v34, %v506_v33  ;;  %v732_v37 = vpop.f32.mrb[3].mxu0  ;;  %v727_v38 = vpop.f32.mrb[1].mxu1  ;;  %v498_v43 = vadd.f32 %v497_v35, %v426_v42 }
 0x21e   : > { %v706_v39 = vmul.f32 -1.442695, %v578_v36 }
 0x220   : > { %820 = vpow2.f32 %v706_v39 }
 0x22a   : > { %v821_v40 = vpop.eup %820 }
 0x22b   : > { %v584_v41 = vadd.f32 1.0, %v821_v40 }
 0x22d   : > { %822 = vrcp.f32 %v584_v41 }
 0x237   : > { %v823_v44 = vpop.eup %822 }
 0x238   : > { %v587_v45 = vmul.f32 %v823_v44, %v498_v43 }
 0x23a   : > { %v588_v46 = vadd.f32 %v587_v45, %v1138_v2 }
 0x23c   : > { %589 = vst [vmem:[%s311_s24] sm:$0xf] %v588_v46 }
 0x23d   : > { %867 = shalt.err (!%p864_p6)
}
 0x23e   : > { %s868_s11 = scalar_lea.hbm %s1176_s14, 64  ;;  %s872_s18 = scalar_lea.hbm %s1254_s10, 256 }
 0x23f   : > { %p869_p3 = scmp.ne.s32.totalorder %s1176_s14, %s868_s11  ;;  %p873_p1 = scmp.lt.u32.totalorder %s1176_s14, %s1254_s10 }
 0x240   : > { %p874_p2 = scmp.lt.u32.totalorder %s872_s18, %s868_s11  ;;  %p876_p8 = scmp.lt.u32.totalorder %s868_s11, %s1176_s14 }
 0x241   : > { %p870_p10 = pnand %p869_p3, %p1255_p9 }
 0x242   : > { %p875_p5 = por %p874_p2, %p873_p1 }
 0x243   : > { %p871_p11 = pneg %p870_p10 }
 0x244   : > { %p877_p12 = por %p876_p8, %p875_p5 }
 0x246   : > { %p878_p0 = pnand %p877_p12, %p871_p11 }
 0x248   : > { %881 = shalt.err (!%p878_p0)
}
 0x249   : > { %735 = dma.vmem_to_hbm [thread:$0]  (%p1255_p9), %s1178_s23, 64, %s1176_s14, %s591_s27  }
 0x24a PF: > { %s1256_s9 = sld [smem:[#allocation8_spill]]  ;;  %p746_p7 = scmp.ge.s32.totalorder %s952_s8, 2 }
 0x24b   : > { %p1257_p13 = scmp.ne.s32.totalorder %s1250_s20, 0 }
 0x24d   : > { %p742_p4 = pnand %p746_p7, %p1257_p13 }
 0x250   : > { %s618_s21 = sand.u32 1, %s1256_s9  }
 0x251   : > { %s619_s28 = scalar_lea.sflag [#allocation4], %s618_s21 }
 0x252   : > { %919 = dma.done.wait (!%p742_p4), %s619_s28, 64  }
 0x253   : > { %921 = vsyncadd (!%p742_p4), %s619_s28, 4294967232  ;;  %s23_s8 = sadd.s32 1, %s952_s8   ;;  %s1258_s17 = sld [smem:[#allocation9_spill]] }
 0x254   : > { %p20_p6 = scmp.ge.s32.totalorder %s23_s8, 6   ;;  %s1259_s23 = sld [smem:[#allocation10_spill]] }
 0x255   : > { %s1260_s24 = smov %s928_s25  ;;  %s1261_s25 = smov %s932_s26 }
 0x256   : > { %s1262_s26 = smov %s1077_s22  ;;  %s1263_s27 = smov %s944_s29 }
 0x257   : > { %s1264_s28 = smov %s948_s30  ;;  %22 = sbr.rel (!%p20_p6) target bundleno = 9 (0x9), region = 93 }
 0x259   : > { %s1265_s29 = smov %s1258_s17 }
 0x25a   : > { %s1266_s30 = smov %s1259_s23 }
 0x25e   :  { %624 = vsyncpa [#allocation3], 1 }
 0x25f   :  { %626 = vsyncpa [#allocation3 + $0x1], 1 }
 0x260   :  { %627 = vsyncpa [#allocation4], 1 }
 0x261   :  { %629 = vsyncpa [#allocation4 + $0x1], 1 }

</bundles_post_ra>
